<compile_context>
chip_gen: v5e
topology: v5e:2x2
jax: 0.10.0
libtpu: 0.0.40
codegen_flags: <defaults>
</compile_context>

<pallas_src>
import functools

import jax
import jax.numpy as jnp
from jax.experimental import pallas as pl
from jax.experimental.pallas import tpu as pltpu


_BN_EPS = 1e-5


# ------------------------------ Pallas kernel ------------------------------ #

def _batchnorm_train(h, gamma, beta):
    """BatchNorm1d over the node axis, training-mode (biased) batch statistics."""
    mean = jnp.mean(h, axis=0, keepdims=True)
    diff = h - mean
    var = jnp.mean(diff * diff, axis=0, keepdims=True)
    return diff * jax.lax.rsqrt(var + _BN_EPS) * gamma + beta


def fused_gcn_kernel(a_ref, x_ref,
                     w1_ref, b1_ref, g1_ref, be1_ref,
                     w2_ref, b2_ref, g2_ref, be2_ref,
                     wl_ref, bl_ref, p_ref, o_ref):
    """Whole GCN forward fused into one kernel (all intermediates stay in VMEM/vregs).

    a_ref: [N, N] bf16 normalized adjacency, x_ref: [N, Cin] bf16 features,
    w*_ref: bf16 GCN weights, BN/bias params f32, p_ref: [G, N] f32 mean-pool matrix,
    o_ref: [G, num_classes] f32 logits.
    """
    a = a_ref[...]  # bf16 [N, N]

    # ---- Layer 1: GCNConv -> ReLU -> BN  (aggregate-first since Cin < hidden) ----
    ax = jnp.dot(a, x_ref[...], preferred_element_type=jnp.float32)          # [N, Cin] f32
    h = jnp.dot(ax.astype(jnp.bfloat16), w1_ref[...],
                preferred_element_type=jnp.float32) + b1_ref[...]            # [N, H]  f32
    h = jnp.maximum(h, 0.0)
    h = _batchnorm_train(h, g1_ref[...], be1_ref[...])

    # ---- Layer 2: GCNConv -> ReLU -> BN ----
    hw = jnp.dot(h.astype(jnp.bfloat16), w2_ref[...],
                 preferred_element_type=jnp.float32)                         # [N, H]  f32
    h2 = jnp.dot(a, hw.astype(jnp.bfloat16),
                 preferred_element_type=jnp.float32) + b2_ref[...]           # [N, H]  f32
    h2 = jnp.maximum(h2, 0.0)
    h2 = _batchnorm_train(h2, g2_ref[...], be2_ref[...])

    # ---- PowerMean (p=1 -> mean) pool, then Linear (mean commutes with affine) ----
    pooled = jnp.dot(p_ref[...], h2, preferred_element_type=jnp.float32)     # [G, H] f32
    o_ref[...] = jnp.dot(pooled, wl_ref[...],
                         preferred_element_type=jnp.float32) + bl_ref[...]   # [G, C] f32
    # TODO(synk): general learnable p != 1 (sign-preserving power mean) not implemented.


# ------------------------------ host wrappers ------------------------------ #

_VMEM = pl.BlockSpec(memory_space=pltpu.MemorySpace.VMEM)


def gcn_fused_forward(a_hat, x, params, pool_mat):
    g = pool_mat.shape[0]
    num_classes = params["w_lin"].shape[1]
    return pl.pallas_call(
        fused_gcn_kernel,
        out_shape=jax.ShapeDtypeStruct((g, num_classes), jnp.float32),
        in_specs=[_VMEM] * 13,
        out_specs=_VMEM,
    )(
        a_hat.astype(jnp.bfloat16),
        x.astype(jnp.bfloat16),
        params["w1"].astype(jnp.bfloat16),
        params["b1"], params["gamma1"], params["beta1"],
        params["w2"].astype(jnp.bfloat16),
        params["b2"], params["gamma2"], params["beta2"],
        params["w_lin"], params["b_lin"],
        pool_mat,
    )


# ------------------------------ glue (plain JAX) --------------------------- #

def build_norm_adj(edge_index, num_nodes):
    """Dense D^{-1/2} (A + I) D^{-1/2}; rows = destination, cols = source.

    Duplicate edges are summed (matches PyG gcn_norm's per-edge-weight sum)."""
    src, dst = edge_index[0], edge_index[1]
    a = jnp.zeros((num_nodes, num_nodes), jnp.float32)
    a = a.at[dst, src].add(1.0)
    a = a + jnp.eye(num_nodes, dtype=jnp.float32)
    deg = a.sum(axis=1)
    dinv = jnp.where(deg > 0, 1.0 / jnp.sqrt(deg), 0.0)
    return dinv[:, None] * a * dinv[None, :]


def build_pool_matrix(batch, num_graphs):
    onehot = (batch[None, :] == jnp.arange(num_graphs)[:, None]).astype(jnp.float32)
    counts = jnp.maximum(onehot.sum(axis=1, keepdims=True), 1.0)
    return onehot / counts


def init_params(key, in_channels, hidden_channels, num_classes):
    k1, k2, k3 = jax.random.split(key, 3)

    def glorot(k, fan_in, fan_out):
        limit = jnp.sqrt(6.0 / (fan_in + fan_out))
        return jax.random.uniform(k, (fan_in, fan_out), jnp.float32, -limit, limit)

    return {
        "w1": glorot(k1, in_channels, hidden_channels),
        "b1": jnp.zeros((1, hidden_channels), jnp.float32),
        "gamma1": jnp.ones((1, hidden_channels), jnp.float32),
        "beta1": jnp.zeros((1, hidden_channels), jnp.float32),
        "w2": glorot(k2, hidden_channels, hidden_channels),
        "b2": jnp.zeros((1, hidden_channels), jnp.float32),
        "gamma2": jnp.ones((1, hidden_channels), jnp.float32),
        "beta2": jnp.zeros((1, hidden_channels), jnp.float32),
        "w_lin": glorot(k3, hidden_channels, num_classes),
        "b_lin": jnp.zeros((1, num_classes), jnp.float32),
    }


@functools.partial(jax.jit, static_argnames=("num_graphs",))
def gcn_forward(params, x, a_hat, batch, num_graphs):
    pool_mat = build_pool_matrix(batch, num_graphs)
    return gcn_fused_forward(a_hat, x, params, pool_mat)


# ---------------------------------- main ----------------------------------- #

if __name__ == "__main__":
    key = jax.random.PRNGKey(0)
    k_x, k_p = jax.random.split(key, 2)

    num_nodes = 16
    in_channels = 8
    hidden_channels = 32
    num_classes = 4
    num_graphs = 2

    # Node features [N, C_in]
    x = jax.random.normal(k_x, (num_nodes, in_channels), jnp.float32)

    # Two 8-node ring graphs (undirected: both edge directions)
    edges = []
    for g in range(num_graphs):
        base = g * 8
        for i in range(8):
            u, v = base + i, base + (i + 1) % 8
            edges.append((u, v))
            edges.append((v, u))
    edge_index = jnp.array(edges, dtype=jnp.int32).T  # [2, E]

    # Graph assignment per node
    batch = jnp.concatenate(
        [jnp.full((8,), g, dtype=jnp.int32) for g in range(num_graphs)]
    )

    a_hat = build_norm_adj(edge_index, num_nodes)
    params = init_params(k_p, in_channels, hidden_channels, num_classes)

    out = gcn_forward(params, x, a_hat, batch, num_graphs)
    out = jax.block_until_ready(out)
    assert out.shape == (num_graphs, num_classes)
    print("KERNEL_OK")
</pallas_src>

<mosaic_0001>
module attributes {stable_mosaic.version = 11 : i64} {
  func.func @fused_gcn_kernel(%arg0: memref<16x16xbf16, #tpu.memory_space<vmem>>, %arg1: memref<16x8xbf16, #tpu.memory_space<vmem>>, %arg2: memref<8x32xbf16, #tpu.memory_space<vmem>>, %arg3: memref<1x32xf32, #tpu.memory_space<vmem>>, %arg4: memref<1x32xf32, #tpu.memory_space<vmem>>, %arg5: memref<1x32xf32, #tpu.memory_space<vmem>>, %arg6: memref<32x32xbf16, #tpu.memory_space<vmem>>, %arg7: memref<1x32xf32, #tpu.memory_space<vmem>>, %arg8: memref<1x32xf32, #tpu.memory_space<vmem>>, %arg9: memref<1x32xf32, #tpu.memory_space<vmem>>, %arg10: memref<32x4xf32, #tpu.memory_space<vmem>>, %arg11: memref<1x4xf32, #tpu.memory_space<vmem>>, %arg12: memref<2x16xf32, #tpu.memory_space<vmem>>, %arg13: memref<2x4xf32, #tpu.memory_space<vmem>>) attributes {dimension_semantics = [], scalar_prefetch = 0 : i64, scratch_operands = 0 : i64, tpu.core_type = #tpu.core_type<tc>} {
    %c0 = arith.constant 0 : index
    %c0_0 = arith.constant 0 : index
    %0 = vector.load %arg0[%c0, %c0_0] : memref<16x16xbf16, #tpu.memory_space<vmem>>, vector<16x16xbf16>
    %c0_1 = arith.constant 0 : index
    %c0_2 = arith.constant 0 : index
    %1 = vector.load %arg1[%c0_1, %c0_2] : memref<16x8xbf16, #tpu.memory_space<vmem>>, vector<16x8xbf16>
    %cst = arith.constant dense<0.000000e+00> : vector<16x8xf32>
    %2 = tpu.matmul %0, %1, %cst {dimension_numbers = #tpu.dot_dimension_numbers<[1], [0], [0], [1], [0, 0, 1, 1], [], []>} : vector<16x16xbf16>, vector<16x8xbf16>, vector<16x8xf32> -> vector<16x8xf32>
    %3 = arith.truncf %2 : vector<16x8xf32> to vector<16x8xbf16>
    %c0_3 = arith.constant 0 : index
    %c0_4 = arith.constant 0 : index
    %4 = vector.load %arg2[%c0_3, %c0_4] : memref<8x32xbf16, #tpu.memory_space<vmem>>, vector<8x32xbf16>
    %cst_5 = arith.constant dense<0.000000e+00> : vector<16x32xf32>
    %5 = tpu.matmul %3, %4, %cst_5 {dimension_numbers = #tpu.dot_dimension_numbers<[1], [0], [0], [1], [0, 0, 1, 1], [], []>} : vector<16x8xbf16>, vector<8x32xbf16>, vector<16x32xf32> -> vector<16x32xf32>
    %c0_6 = arith.constant 0 : index
    %c0_7 = arith.constant 0 : index
    %6 = vector.load %arg3[%c0_6, %c0_7] : memref<1x32xf32, #tpu.memory_space<vmem>>, vector<1x32xf32>
    %7 = vector.broadcast %6 : vector<1x32xf32> to vector<16x32xf32>
    %8 = arith.addf %5, %7 : vector<16x32xf32>
    %cst_8 = arith.constant 0.000000e+00 : f32
    %9 = vector.broadcast %cst_8 : f32 to vector<16x32xf32>
    %10 = arith.maximumf %8, %9 : vector<16x32xf32>
    %c0_9 = arith.constant 0 : index
    %c0_10 = arith.constant 0 : index
    %11 = vector.load %arg4[%c0_9, %c0_10] : memref<1x32xf32, #tpu.memory_space<vmem>>, vector<1x32xf32>
    %c0_11 = arith.constant 0 : index
    %c0_12 = arith.constant 0 : index
    %12 = vector.load %arg5[%c0_11, %c0_12] : memref<1x32xf32, #tpu.memory_space<vmem>>, vector<1x32xf32>
    %cst_13 = arith.constant dense<0.000000e+00> : vector<32xf32>
    %13 = vector.multi_reduction <add>, %10, %cst_13 [0] : vector<16x32xf32> to vector<32xf32>
    %14 = vector.shape_cast %13 : vector<32xf32> to vector<1x32xf32>
    %cst_14 = arith.constant 1.600000e+01 : f32
    %15 = vector.broadcast %cst_14 : f32 to vector<1x32xf32>
    %16 = arith.divf %14, %15 : vector<1x32xf32>
    %17 = vector.broadcast %16 : vector<1x32xf32> to vector<16x32xf32>
    %18 = arith.subf %10, %17 : vector<16x32xf32>
    %19 = arith.mulf %18, %18 : vector<16x32xf32>
    %cst_15 = arith.constant dense<0.000000e+00> : vector<32xf32>
    %20 = vector.multi_reduction <add>, %19, %cst_15 [0] : vector<16x32xf32> to vector<32xf32>
    %21 = vector.shape_cast %20 : vector<32xf32> to vector<1x32xf32>
    %cst_16 = arith.constant 1.600000e+01 : f32
    %22 = vector.broadcast %cst_16 : f32 to vector<1x32xf32>
    %23 = arith.divf %21, %22 : vector<1x32xf32>
    %cst_17 = arith.constant 9.99999974E-6 : f32
    %24 = vector.broadcast %cst_17 : f32 to vector<1x32xf32>
    %25 = arith.addf %23, %24 : vector<1x32xf32>
    %26 = math.rsqrt %25 : vector<1x32xf32>
    %27 = vector.broadcast %26 : vector<1x32xf32> to vector<16x32xf32>
    %28 = arith.mulf %18, %27 : vector<16x32xf32>
    %29 = vector.broadcast %11 : vector<1x32xf32> to vector<16x32xf32>
    %30 = arith.mulf %28, %29 : vector<16x32xf32>
    %31 = vector.broadcast %12 : vector<1x32xf32> to vector<16x32xf32>
    %32 = arith.addf %30, %31 : vector<16x32xf32>
    %33 = arith.truncf %32 : vector<16x32xf32> to vector<16x32xbf16>
    %c0_18 = arith.constant 0 : index
    %c0_19 = arith.constant 0 : index
    %34 = vector.load %arg6[%c0_18, %c0_19] : memref<32x32xbf16, #tpu.memory_space<vmem>>, vector<32x32xbf16>
    %cst_20 = arith.constant dense<0.000000e+00> : vector<16x32xf32>
    %35 = tpu.matmul %33, %34, %cst_20 {dimension_numbers = #tpu.dot_dimension_numbers<[1], [0], [0], [1], [0, 0, 1, 1], [], []>} : vector<16x32xbf16>, vector<32x32xbf16>, vector<16x32xf32> -> vector<16x32xf32>
    %36 = arith.truncf %35 : vector<16x32xf32> to vector<16x32xbf16>
    %cst_21 = arith.constant dense<0.000000e+00> : vector<16x32xf32>
    %37 = tpu.matmul %0, %36, %cst_21 {dimension_numbers = #tpu.dot_dimension_numbers<[1], [0], [0], [1], [0, 0, 1, 1], [], []>} : vector<16x16xbf16>, vector<16x32xbf16>, vector<16x32xf32> -> vector<16x32xf32>
    %c0_22 = arith.constant 0 : index
    %c0_23 = arith.constant 0 : index
    %38 = vector.load %arg7[%c0_22, %c0_23] : memref<1x32xf32, #tpu.memory_space<vmem>>, vector<1x32xf32>
    %39 = vector.broadcast %38 : vector<1x32xf32> to vector<16x32xf32>
    %40 = arith.addf %37, %39 : vector<16x32xf32>
    %cst_24 = arith.constant 0.000000e+00 : f32
    %41 = vector.broadcast %cst_24 : f32 to vector<16x32xf32>
    %42 = arith.maximumf %40, %41 : vector<16x32xf32>
    %c0_25 = arith.constant 0 : index
    %c0_26 = arith.constant 0 : index
    %43 = vector.load %arg8[%c0_25, %c0_26] : memref<1x32xf32, #tpu.memory_space<vmem>>, vector<1x32xf32>
    %c0_27 = arith.constant 0 : index
    %c0_28 = arith.constant 0 : index
    %44 = vector.load %arg9[%c0_27, %c0_28] : memref<1x32xf32, #tpu.memory_space<vmem>>, vector<1x32xf32>
    %cst_29 = arith.constant dense<0.000000e+00> : vector<32xf32>
    %45 = vector.multi_reduction <add>, %42, %cst_29 [0] : vector<16x32xf32> to vector<32xf32>
    %46 = vector.shape_cast %45 : vector<32xf32> to vector<1x32xf32>
    %cst_30 = arith.constant 1.600000e+01 : f32
    %47 = vector.broadcast %cst_30 : f32 to vector<1x32xf32>
    %48 = arith.divf %46, %47 : vector<1x32xf32>
    %49 = vector.broadcast %48 : vector<1x32xf32> to vector<16x32xf32>
    %50 = arith.subf %42, %49 : vector<16x32xf32>
    %51 = arith.mulf %50, %50 : vector<16x32xf32>
    %cst_31 = arith.constant dense<0.000000e+00> : vector<32xf32>
    %52 = vector.multi_reduction <add>, %51, %cst_31 [0] : vector<16x32xf32> to vector<32xf32>
    %53 = vector.shape_cast %52 : vector<32xf32> to vector<1x32xf32>
    %cst_32 = arith.constant 1.600000e+01 : f32
    %54 = vector.broadcast %cst_32 : f32 to vector<1x32xf32>
    %55 = arith.divf %53, %54 : vector<1x32xf32>
    %cst_33 = arith.constant 9.99999974E-6 : f32
    %56 = vector.broadcast %cst_33 : f32 to vector<1x32xf32>
    %57 = arith.addf %55, %56 : vector<1x32xf32>
    %58 = math.rsqrt %57 : vector<1x32xf32>
    %59 = vector.broadcast %58 : vector<1x32xf32> to vector<16x32xf32>
    %60 = arith.mulf %50, %59 : vector<16x32xf32>
    %61 = vector.broadcast %43 : vector<1x32xf32> to vector<16x32xf32>
    %62 = arith.mulf %60, %61 : vector<16x32xf32>
    %63 = vector.broadcast %44 : vector<1x32xf32> to vector<16x32xf32>
    %64 = arith.addf %62, %63 : vector<16x32xf32>
    %c0_34 = arith.constant 0 : index
    %c0_35 = arith.constant 0 : index
    %65 = vector.load %arg12[%c0_34, %c0_35] : memref<2x16xf32, #tpu.memory_space<vmem>>, vector<2x16xf32>
    %cst_36 = arith.constant dense<0.000000e+00> : vector<2x32xf32>
    %66 = tpu.matmul %65, %64, %cst_36 {dimension_numbers = #tpu.dot_dimension_numbers<[1], [0], [0], [1], [0, 0, 1, 1], [], []>} : vector<2x16xf32>, vector<16x32xf32>, vector<2x32xf32> -> vector<2x32xf32>
    %c0_37 = arith.constant 0 : index
    %c0_38 = arith.constant 0 : index
    %67 = vector.load %arg10[%c0_37, %c0_38] : memref<32x4xf32, #tpu.memory_space<vmem>>, vector<32x4xf32>
    %cst_39 = arith.constant dense<0.000000e+00> : vector<2x4xf32>
    %68 = tpu.matmul %66, %67, %cst_39 {dimension_numbers = #tpu.dot_dimension_numbers<[1], [0], [0], [1], [0, 0, 1, 1], [], []>} : vector<2x32xf32>, vector<32x4xf32>, vector<2x4xf32> -> vector<2x4xf32>
    %c0_40 = arith.constant 0 : index
    %c0_41 = arith.constant 0 : index
    %69 = vector.load %arg11[%c0_40, %c0_41] : memref<1x4xf32, #tpu.memory_space<vmem>>, vector<1x4xf32>
    %70 = vector.broadcast %69 : vector<1x4xf32> to vector<2x4xf32>
    %71 = arith.addf %68, %70 : vector<2x4xf32>
    %c0_42 = arith.constant 0 : index
    %c0_43 = arith.constant 0 : index
    %72 = vector.load %arg13[%c0_42, %c0_43] : memref<2x4xf32, #tpu.memory_space<vmem>>, vector<2x4xf32>
    tpu.vector_store %arg13[%c0_42, %c0_43], %71 {strides = array<i32>} : memref<2x4xf32, #tpu.memory_space<vmem>>, vector<2x4xf32>,
    return
  }
}

</mosaic_0001>

<bundles_post_ra>
// kernel: gcn_forward.1
= control target key start
LH: loop header
LB: loop body
LE: loop exit
PB: predicated region body
PF: predicated region fallthrough
CT: control target
= control target key end

     0   :  { %vm61_vm0 = vcmask 130048   ;;  %s559_s0 = inlined_call_operand.vmem [shape: bf16[16,16], index: 0, kind: input, shape index: {}]   ;;  %s560_s1 = inlined_call_operand.vmem [shape: bf16[16,8], index: 1, kind: input, shape index: {}]   ;;  %s561_s2 = inlined_call_operand.vmem [shape: bf16[8,32], index: 2, kind: input, shape index: {}]   ;;  %s562_s3 = inlined_call_operand.vmem [shape: f32[1,32], index: 3, kind: input, shape index: {}]   ;;  %s563_s4 = inlined_call_operand.vmem [shape: f32[1,32], index: 4, kind: input, shape index: {}]   ;;  %s564_s5 = inlined_call_operand.vmem [shape: f32[1,32], index: 5, kind: input, shape index: {}]   ;;  %s565_s6 = inlined_call_operand.vmem [shape: bf16[32,32], index: 6, kind: input, shape index: {}]   ;;  %s566_s7 = inlined_call_operand.vmem [shape: f32[1,32], index: 7, kind: input, shape index: {}]   ;;  %s567_s8 = inlined_call_operand.vmem [shape: f32[1,32], index: 8, kind: input, shape index: {}]   ;;  %s568_s9 = inlined_call_operand.vmem [shape: f32[1,32], index: 9, kind: input, shape index: {}]   ;;  %s569_s10 = inlined_call_operand.vmem [shape: f32[32,4], index: 10, kind: input, shape index: {}]   ;;  %s570_s11 = inlined_call_operand.vmem [shape: f32[1,4], index: 11, kind: input, shape index: {}]   ;;  %s571_s12 = inlined_call_operand.vmem [shape: f32[2,16], index: 12, kind: input, shape index: {}]   ;;  %s572_s13 = inlined_call_operand.hbm [shape: f32[2,4], index: 13, kind: output, shape index: {}]  }
   0x1   :  { %v366_v0 = vld [vmem:[%s560_s1] sm:$0xff] }
   0x2   :  { %v488_v1 = vld [vmem:[%s559_s0] sm:$0xff]  ;;  %72 = vmatpush.bf16.msra.mxu0 %v366_v0 }
   0x3   :  { %18 = vsyncpa [#allocation3], 0  ;;  %v80_v2 = vld [vmem:[%s561_s2] sm:$0xf]  ;;  %vm89_vm1 = vcmask 1043456   ;;  %vm85_vm2 = vcmask 64512  }
   0x4   :  { %v91_v3 = vsel %vm89_vm1, %v80_v2, 0  ;;  %v410_v8 = vmov 16.0   ;;  %v371_v9 = vld [vmem:[%s562_s3] ss:$0 sm:$0xff]  ;;  %vm111_vm3 = vcmask 261120   ;;  %v368_v39 = vld [vmem:[%s565_s6 + $0x8] sm:$0xff] }
   0x5   :  { %351 = vmatmul.msk.bf16.vlgmr.msra.gmra.mxu0 %vm61_vm0, %v488_v1  ;;  %100 = vmatpush.bf16.msra.mxu1 %v91_v3  ;;  %378 = vrcp.f32 %v410_v8  ;;  %v367_v42 = vld [vmem:[%s565_s6] sm:$0xff]  ;;  %s334_s14 = sshll.u32 %s572_s13, 4  ;;  %vm325_vm11 = vcmask 25600   ;;  %s335_s14 = int_to_ptr.hbm [resolvable:$true] %s334_s14 }
   0x6   :  { %192 = vmatpush.bf16.msra.mxu2 %v368_v39  ;;  %v372_v54 = vld [vmem:[%s563_s4] ss:$0 sm:$0xff] }
   0x7   :  { %v373_v58 = vld [vmem:[%s564_s5] ss:$0 sm:$0xff] }
   0x8   :  { %v294_v39 = vld [vmem:[%s569_s10] sm:$0xff] }
   0xa   :  { %193 = vmatpush.bf16.msra.mxu2 %v367_v42 }
   0xb   :  { %v379_v11 = vpop.eup %378 }
   0xc   :  { %v122_v15 = vmul.f32 16.0, %v379_v11  ;;  %vm126_vm4 = vweird.f32 %v379_v11 }
   0xe   :  { %v123_v19 = vsub.f32 1.0, %v122_v15 }
  0x10   :  { %v124_v22 = vmul.f32 %v379_v11, %v123_v19 }
  0x12   :  { %v125_v25 = vadd.f32 %v379_v11, %v124_v22 }
  0x14   :  { %v500_v28 = vsel %vm126_vm4, %v379_v11, %v125_v25 }
  0x82   :  { %v74_v4 = vpop.f32.mrf.mxu0 }
  0x8a   :  { %v76_v5 = vpop.f32.mrf.mxu0 }
  0x8b   :  { %v79_v6 = vpack.c.bf16 %v76_v5, %v74_v4  ;;  %v374_v5 = vld [vmem:[%s566_s7] ss:$0 sm:$0xff] }
  0x8d   :  { %352 = vmatmul.msk.bf16.vlgmr.msra.gmra.mxu1 %vm85_vm2, %v79_v6 }
 0x10a   :  { %v102_v7 = vpop.f32.mrf.mxu1 }
 0x10b   :  { %v103_v10 = vadd.f32 %v371_v9, %v102_v7 }
 0x10d   :  { %v107_v13 = vmax.f32 %v103_v10, 0.0 }
 0x10f   :  { %v112_v17 = vsel %vm111_vm3, %v107_v13, 0.0 }
 0x112   :  { %v104_v12 = vpop.f32.mrf.mxu1 }
 0x113   :  { %v105_v14 = vadd.f32 %v371_v9, %v104_v12 }
 0x115   :  { %v108_v16 = vmax.f32 %v105_v14, 0.0 }
 0x117   :  { %v113_v18 = vsel %vm111_vm3, %v108_v16, 0.0 }
 0x118   :  { %v114_v20 = vadd.f32 %v113_v18, %v112_v17 }
 0x11a   :  { %v115_v21 = vrot.slane %v114_v20, 4 }
 0x11c   :  { %v116_v23 = vadd.f32 %v115_v21, %v114_v20 }
 0x11e   :  { %v117_v24 = vrot.slane %v116_v23, 2 }
 0x120   :  { %v118_v26 = vadd.f32 %v117_v24, %v116_v23 }
 0x122   :  { %v119_v27 = vrot.slane %v118_v26, 1 }
 0x124   :  { %v120_v29 = vadd.f32 %v119_v27, %v118_v26 }
 0x126   :  { %v128_v30 = vmul.f32 %v500_v28, %v120_v29 }
 0x128   :  { %v129_v31 = vsub.f32 %v107_v13, %v128_v30  ;;  %v130_v32 = vsub.f32 %v108_v16, %v128_v30 }
 0x12a   :  { %v131_v33 = vmul.f32 %v129_v31, %v129_v31  ;;  %v132_v34 = vmul.f32 %v130_v32, %v130_v32 }
 0x12c   :  { %v133_v35 = vsel %vm111_vm3, %v131_v33, 0.0  ;;  %v134_v36 = vsel %vm111_vm3, %v132_v34, 0.0  ;;  %v297_v34 = vld [vmem:[%s569_s10 + $0x18] sm:$0xff] }
 0x12d   :  { %v135_v37 = vadd.f32 %v134_v36, %v133_v35  ;;  %v296_v35 = vld [vmem:[%s569_s10 + $0x10] sm:$0xff]  ;;  %317 = vmatpush.msrb.mxu1 %v297_v34 }
 0x12f   :  { %v136_v38 = vrot.slane %v135_v37, 4  ;;  %318 = vmatpush.msrb.mxu1 %v296_v35 }
 0x131   :  { %v137_v40 = vadd.f32 %v136_v38, %v135_v37  ;;  %v295_v37 = vld [vmem:[%s569_s10 + $0x8] sm:$0xff] }
 0x132   :  { %319 = vmatpush.msrb.mxu1 %v295_v37 }
 0x133   :  { %v138_v41 = vrot.slane %v137_v40, 2 }
 0x134   :  { %320 = vmatpush.msrb.mxu1 %v294_v39 }
 0x135   :  { %v139_v43 = vadd.f32 %v138_v41, %v137_v40 }
 0x137   :  { %v140_v44 = vrot.slane %v139_v43, 1 }
 0x139   :  { %v141_v45 = vadd.f32 %v140_v44, %v139_v43 }
 0x13b   :  { %v142_v46 = vmul.f32 %v141_v45, %v500_v28  ;;  %v375_v45 = vld [vmem:[%s567_s8] ss:$0 sm:$0xff] }
 0x13d   :  { %v143_v47 = vadd.f32 1e-05, %v142_v46 }
 0x13f   :  { %380 = vrsqrt.f32 %v143_v47  ;;  %vm150_vm6 = vweird.f32 %v143_v47 }
 0x145   :  { %v381_v48 = vpop.eup %380 }
 0x146   :  { %v145_v49 = vmul.f32 %v381_v48, %v143_v47  ;;  %vm151_vm5 = vweird.f32 %v381_v48 }
 0x147   :  { %vm152_vm7 = vmor %vm150_vm6, %vm151_vm5 }
 0x148   :  { %v146_v50 = vmul.f32 %v381_v48, %v145_v49 }
 0x14a   :  { %v147_v51 = vmul.f32 0.5, %v146_v50 }
 0x14c   :  { %v148_v52 = vsub.f32 1.5, %v147_v51 }
 0x14e   :  { %v149_v53 = vmul.f32 %v381_v48, %v148_v52 }
 0x150   :  { %v153_v55 = vsel %vm152_vm7, %v381_v48, %v149_v53  ;;  %v376_v48 = vld [vmem:[%s568_s9] ss:$0 sm:$0xff]  ;;  %s411_s9 = smov [#allocation2]  }
 0x151   :  { %v154_v56 = vmul.f32 %v153_v55, %v129_v31  ;;  %v155_v57 = vmul.f32 %v153_v55, %v130_v32  ;;  %s332_s1 = sshll.u32 %s411_s9, 4  ;;  %s333_s1 = int_to_ptr.vmem [resolvable:$true] %s332_s1 }
 0x153   :  { %v160_v59 = vmul.f32 %v372_v54, %v155_v57  ;;  %v159_v60 = vmul.f32 %v372_v54, %v154_v56  ;;  %v270_v54 = vld [vmem:[%s571_s12] sm:$0x3] }
 0x154   :  { %v377_v56 = vld [vmem:[%s570_s11] ss:$0 sm:$0xff] }
 0x155   :  { %v164_v61 = vadd.f32 %v373_v58, %v159_v60  ;;  %v165_v62 = vadd.f32 %v373_v58, %v160_v59 }
 0x157   :  { %v166_v63 = vpack.c.bf16 %v165_v62, %v164_v61 }
 0x159   :  { %361 = vmatmul.msk.bf16.vlgmr.msra.gmra.mxu2 %vm111_vm3, %v166_v63 }
 0x1dc   :  { %v195_v0 = vpop.f32.mrf.mxu2 }
 0x1e4   :  { %v197_v2 = vpop.f32.mrf.mxu2 }
 0x1e5   :  { %v200_v3 = vpack.c.bf16 %v197_v2, %v195_v0 }
 0x1e7   :  { %212 = vmatpush.bf16.msra.mxu3 %v200_v3 }
 0x1ea   :  { %362 = vmatmul.msk.bf16.vlgmr.msra.gmra.mxu3 %vm61_vm0, %v488_v1 }
 0x26d   :  { %v214_v4 = vpop.f32.mrf.mxu3 }
 0x26e   :  { %v215_v6 = vadd.f32 %v374_v5, %v214_v4 }
 0x270   :  { %v219_v8 = vmax.f32 %v215_v6, 0.0 }
 0x272   :  { %v223_v11 = vsel %vm111_vm3, %v219_v8, 0.0 }
 0x275   :  { %v216_v7 = vpop.f32.mrf.mxu3 }
 0x276   :  { %v217_v9 = vadd.f32 %v374_v5, %v216_v7 }
 0x278   :  { %v220_v10 = vmax.f32 %v217_v9, 0.0 }
 0x27a   :  { %v224_v12 = vsel %vm111_vm3, %v220_v10, 0.0 }
 0x27b   :  { %v225_v13 = vadd.f32 %v224_v12, %v223_v11 }
 0x27d   :  { %v226_v14 = vrot.slane %v225_v13, 4 }
 0x27f   :  { %v227_v15 = vadd.f32 %v226_v14, %v225_v13 }
 0x281   :  { %v228_v16 = vrot.slane %v227_v15, 2 }
 0x283   :  { %v229_v17 = vadd.f32 %v228_v16, %v227_v15 }
 0x285   :  { %v230_v1 = vrot.slane %v229_v17, 1 }
 0x287   :  { %v231_v18 = vadd.f32 %v230_v1, %v229_v17 }
 0x289   :  { %v232_v19 = vmul.f32 %v231_v18, %v500_v28 }
 0x28b   :  { %v233_v20 = vsub.f32 %v219_v8, %v232_v19  ;;  %v234_v21 = vsub.f32 %v220_v10, %v232_v19 }
 0x28d   :  { %v235_v22 = vmul.f32 %v233_v20, %v233_v20  ;;  %v236_v23 = vmul.f32 %v234_v21, %v234_v21 }
 0x28f   :  { %v237_v24 = vsel %vm111_vm3, %v235_v22, 0.0  ;;  %v238_v25 = vsel %vm111_vm3, %v236_v23, 0.0 }
 0x290   :  { %v239_v26 = vadd.f32 %v238_v25, %v237_v24 }
 0x292   :  { %v240_v27 = vrot.slane %v239_v26, 4 }
 0x294   :  { %v241_v29 = vadd.f32 %v240_v27, %v239_v26 }
 0x296   :  { %v242_v30 = vrot.slane %v241_v29, 2 }
 0x298   :  { %v243_v31 = vadd.f32 %v242_v30, %v241_v29 }
 0x29a   :  { %v244_v32 = vrot.slane %v243_v31, 1 }
 0x29c   :  { %v245_v33 = vadd.f32 %v244_v32, %v243_v31 }
 0x29e   :  { %v246_v36 = vmul.f32 %v245_v33, %v500_v28 }
 0x2a0   :  { %v247_v38 = vadd.f32 1e-05, %v246_v36 }
 0x2a2   :  { %382 = vrsqrt.f32 %v247_v38  ;;  %vm254_vm9 = vweird.f32 %v247_v38 }
 0x2a8   :  { %v383_v40 = vpop.eup %382 }
 0x2a9   :  { %v249_v41 = vmul.f32 %v383_v40, %v247_v38  ;;  %vm255_vm8 = vweird.f32 %v383_v40 }
 0x2aa   :  { %vm256_vm10 = vmor %vm254_vm9, %vm255_vm8 }
 0x2ab   :  { %v250_v42 = vmul.f32 %v383_v40, %v249_v41 }
 0x2ad   :  { %v251_v43 = vmul.f32 0.5, %v250_v42 }
 0x2af   :  { %v252_v44 = vsub.f32 1.5, %v251_v43 }
 0x2b1   :  { %v253_v28 = vmul.f32 %v383_v40, %v252_v44 }
 0x2b3   :  { %v257_v46 = vsel %vm256_vm10, %v383_v40, %v253_v28 }
 0x2b4   :  { %v259_v47 = vmul.f32 %v257_v46, %v234_v21  ;;  %v258_v49 = vmul.f32 %v257_v46, %v233_v20 }
 0x2b6   :  { %v264_v50 = vmul.f32 %v375_v45, %v259_v47  ;;  %v263_v51 = vmul.f32 %v375_v45, %v258_v49 }
 0x2b8   :  { %v269_v52 = vadd.f32 %v376_v48, %v264_v50  ;;  %v268_v53 = vadd.f32 %v376_v48, %v263_v51 }
 0x2ba   :  { %288 = vmatpush.msrb.mxu0 %v269_v52 }
 0x2bc   :  { %289 = vmatpush.msrb.mxu0 %v268_v53 }
 0x2bd   :  { %363 = vmatmul.msk.f32.vlgmr.msrb.gmra.mxu0 %vm61_vm0, %v270_v54 }
 0x33a   :  { %v291_v55 = vpop.f32.mrf.mxu0 }
 0x33b   :  { %364 = vmatmul.msk.f32.vlgmr.msrb.gmra.mxu1 %vm111_vm3, %v291_v55 }
 0x3b8   :  { %v322_v57 = vpop.f32.mrf.mxu1 }
 0x3b9   :  { %v323_v58 = vadd.f32 %v377_v56, %v322_v57 }
 0x3bb   :  { %326 = vst.msk [vmem:[#allocation2] sm:$0x3] %vm325_vm11, %v323_v58 }
 0x3bc   :  { %337 = dma.vmem_to_hbm [thread:$0]  %s333_s1, 32, %s335_s14, [#allocation3]  }
 0x3bd   :  { %408 = dma.done.wait [#allocation3], 32  }
 0x3be   :  { %409 = vsyncadd [#allocation3], 4294967264 }
 0x3bf   :  { %342 = vsyncpa [#allocation3], 1 }

</bundles_post_ra>
